<compile_context>
chip_gen: v5e
topology: v5e:2x2
jax: 0.10.0
libtpu: 0.0.40
codegen_flags: <defaults>
</compile_context>

<pallas_src>
import math

import jax
import jax.numpy as jnp
from jax import lax
from jax.experimental import pallas as pl
from jax.experimental.pallas import tpu as pltpu


def _cosine_sim_kernel(feat_ref, centers_ref, inv_f_ref, inv_c_ref, out_ref):
    # (TM, D) x (TN, D) -> (TM, TN), contracting the shared D axis directly.
    raw = lax.dot_general(
        feat_ref[...], centers_ref[...],
        dimension_numbers=(((1,), (1,)), ((), ())),
        preferred_element_type=jnp.float32)
    # Post-scale by the precomputed inverse norms: (TM,1) row scale and
    # (1,TN) column scale — O(tm*tn) VPU work, cheap broadcasts, no XLU.
    out_ref[...] = (raw * inv_f_ref[...] * inv_c_ref[...]).astype(out_ref.dtype)


def _round_up(x: int, m: int) -> int:
    return ((x + m - 1) // m) * m


def _sublane_multiple(dtype) -> int:
    # Sub-32-bit dtypes pack along sublanes: 8 rows f32, 16 bf16, 32 int8/fp8.
    return max(8, 32 // jnp.dtype(dtype).itemsize)


def _inv_l2_norm(x: jax.Array, axis: int) -> jax.Array:
    # 1 / max(||x||, 1e-12) == rsqrt(max(sum(x*x), 1e-24))
    ss = jnp.sum(x.astype(jnp.float32) ** 2, axis=axis, keepdims=True)
    return lax.rsqrt(jnp.maximum(ss, 1e-24))


def cosine_similarity(feat: jax.Array, centers: jax.Array,
                      *, tm: int = 256, tn: int = 256,
                      resident_vmem_budget: int = 40 << 20) -> jax.Array:
    """feat: (N, feat_dim), centers: (num_centers, feat_dim) -> (N, num_centers)."""
    n, d = feat.shape
    c, d2 = centers.shape
    assert d == d2, "feat_dim mismatch"

    # One dtype into the MXU (bf16 feat => bf16 centers fast path).
    centers = centers.astype(feat.dtype)

    # Tiny mem-bound pre-pass: per-row inverse norms, hoisted out of the grid.
    inv_f = _inv_l2_norm(feat, axis=1)          # (N, 1)  f32
    inv_c = _inv_l2_norm(centers, axis=1).T     # (1, C)  f32

    sub = _sublane_multiple(feat.dtype)
    tm = _round_up(min(tm, _round_up(n, sub)), sub)

    itemsize = jnp.dtype(feat.dtype).itemsize

    # --- decide whether the whole (column-padded) centers array stays
    #     resident in VMEM while feat row-tiles stream ----------------------
    c_pad128 = _round_up(c, 128)
    resident_need = 2 * (c_pad128 * d * itemsize          # centers (x2 buffers)
                         + tm * d * itemsize               # feat tile
                         + tm * c_pad128 * itemsize        # out tile
                         + tm * 4 + c_pad128 * 4)          # inv norms
    resident = resident_need <= resident_vmem_budget

    if resident:
        tn = c_pad128
    else:
        tn = _round_up(min(tn, c_pad128), 128)

    # Pad only the column (centers) dim so tn divides it exactly; padded
    # columns carry zero centers and zero inv_c, and are sliced off at the end.
    c_pad = _round_up(c, tn)
    if c_pad != c:
        centers = jnp.pad(centers, ((0, c_pad - c), (0, 0)))
        inv_c = jnp.pad(inv_c, ((0, 0), (0, c_pad - c)))

    grid_rows = pl.cdiv(n, tm)

    if resident:
        grid = (grid_rows,)
        in_specs = [
            pl.BlockSpec((tm, d),    lambda i: (i, 0)),   # feat row tile
            pl.BlockSpec((c_pad, d), lambda i: (0, 0)),   # centers: resident
            pl.BlockSpec((tm, 1),    lambda i: (i, 0)),   # inv feat norms
            pl.BlockSpec((1, c_pad), lambda i: (0, 0)),   # inv center norms
        ]
        out_specs = pl.BlockSpec((tm, c_pad), lambda i: (i, 0))
        dim_sem = ("parallel",)
        vmem_need = resident_need
    else:
        grid = (grid_rows, c_pad // tn)
        in_specs = [
            pl.BlockSpec((tm, d), lambda i, j: (i, 0)),
            pl.BlockSpec((tn, d), lambda i, j: (j, 0)),
            pl.BlockSpec((tm, 1), lambda i, j: (i, 0)),
            pl.BlockSpec((1, tn), lambda i, j: (0, j)),
        ]
        out_specs = pl.BlockSpec((tm, tn), lambda i, j: (i, j))
        dim_sem = ("parallel", "parallel")
        vmem_need = 2 * (tm * d * itemsize + tn * d * itemsize
                         + tm * tn * itemsize + tm * 4 + tn * 4)

    # Explicit scoped-VMEM limit: real need + headroom, clamped to a value
    # that is safe on every generation (v7x has only 64 MiB per TC).
    vmem_limit = int(min(max(vmem_need + (4 << 20), 16 << 20), 64 << 20))

    out = pl.pallas_call(
        _cosine_sim_kernel,
        out_shape=jax.ShapeDtypeStruct((n, c_pad), feat.dtype),
        grid=grid,
        in_specs=in_specs,
        out_specs=out_specs,
        compiler_params=pltpu.CompilerParams(
            dimension_semantics=dim_sem,
            vmem_limit_bytes=vmem_limit),
    )(feat, centers, inv_f, inv_c)

    return out if c_pad == c else out[:, :c]


def init_centers(key, num_centers: int, feat_dim: int) -> jax.Array:
    """kaiming_uniform_(a=sqrt(5)) equivalent: bound = 1/sqrt(fan_in)."""
    bound = 1.0 / math.sqrt(feat_dim)
    return jax.random.uniform(
        key, (num_centers, feat_dim), dtype=jnp.float32,
        minval=-bound, maxval=bound,
    )


def _reference(feat, centers):
    eps = 1e-12
    fn = feat / jnp.maximum(jnp.linalg.norm(feat, axis=1, keepdims=True), eps)
    cn = centers / jnp.maximum(jnp.linalg.norm(centers, axis=1, keepdims=True), eps)
    return fn @ cn.T


if __name__ == "__main__":
    batch = 8
    feat_dim = 32
    num_centers = 16

    key = jax.random.PRNGKey(0)
    k_feat, k_centers = jax.random.split(key)

    feat = jax.random.normal(k_feat, (batch, feat_dim), dtype=jnp.float32)
    centers = init_centers(k_centers, num_centers, feat_dim)

    out = cosine_similarity(feat, centers)
    out = jax.block_until_ready(out)

    ref = _reference(feat, centers)
    assert out.shape == (batch, num_centers), out.shape
    assert jnp.allclose(out, ref, atol=1e-5, rtol=1e-5), "mismatch vs reference"

    print("KERNEL_OK")
</pallas_src>

<mosaic_0001>
module attributes {stable_mosaic.version = 11 : i64} {
  func.func @_cosine_sim_kernel(%arg0: i32, %arg1: memref<8x32xf32, #tpu.memory_space<vmem>>, %arg2: memref<128x32xf32, #tpu.memory_space<vmem>>, %arg3: memref<8x1xf32, #tpu.memory_space<vmem>>, %arg4: memref<1x128xf32, #tpu.memory_space<vmem>>, %arg5: memref<8x128xf32, #tpu.memory_space<vmem>>) attributes {dimension_semantics = [#tpu.dimension_semantics<parallel>], iteration_bounds = array<i64: 1>, scalar_prefetch = 0 : i64, scratch_operands = 0 : i64, tpu.core_type = #tpu.core_type<tc>, window_params = [{transform_indices = @transform_0, window_bounds = array<i64: 8, 32>}, {pipeline_mode = #tpu.pipeline_mode<synchronous>, transform_indices = @transform_1, window_bounds = array<i64: 128, 32>}, {transform_indices = @transform_2, window_bounds = array<i64: 8, 1>}, {pipeline_mode = #tpu.pipeline_mode<synchronous>, transform_indices = @transform_3, window_bounds = array<i64: 1, 128>}, {transform_indices = @transform_4, window_bounds = array<i64: 8, 128>}]} {
    %c0 = arith.constant 0 : index
    %c0_0 = arith.constant 0 : index
    %0 = vector.load %arg1[%c0, %c0_0] : memref<8x32xf32, #tpu.memory_space<vmem>>, vector<8x32xf32>
    %c0_1 = arith.constant 0 : index
    %c0_2 = arith.constant 0 : index
    %1 = vector.load %arg2[%c0_1, %c0_2] : memref<128x32xf32, #tpu.memory_space<vmem>>, vector<128x32xf32>
    %cst = arith.constant dense<0.000000e+00> : vector<8x128xf32>
    %2 = tpu.matmul %0, %1, %cst {dimension_numbers = #tpu.dot_dimension_numbers<[1], [1], [0], [0], [0, 0, 1, 0], [], []>} : vector<8x32xf32>, vector<128x32xf32>, vector<8x128xf32> -> vector<8x128xf32>
    %c0_3 = arith.constant 0 : index
    %c0_4 = arith.constant 0 : index
    %3 = vector.load %arg3[%c0_3, %c0_4] : memref<8x1xf32, #tpu.memory_space<vmem>>, vector<8x1xf32>
    %4 = vector.broadcast %3 : vector<8x1xf32> to vector<8x128xf32>
    %5 = arith.mulf %2, %4 : vector<8x128xf32>
    %c0_5 = arith.constant 0 : index
    %c0_6 = arith.constant 0 : index
    %6 = vector.load %arg4[%c0_5, %c0_6] : memref<1x128xf32, #tpu.memory_space<vmem>>, vector<1x128xf32>
    %7 = vector.broadcast %6 : vector<1x128xf32> to vector<8x128xf32>
    %8 = arith.mulf %5, %7 : vector<8x128xf32>
    %c0_7 = arith.constant 0 : index
    %c0_8 = arith.constant 0 : index
    %9 = vector.load %arg5[%c0_7, %c0_8] : memref<8x128xf32, #tpu.memory_space<vmem>>, vector<8x128xf32>
    tpu.vector_store %arg5[%c0_7, %c0_8], %8 {strides = array<i32>} : memref<8x128xf32, #tpu.memory_space<vmem>>, vector<8x128xf32>,
    return
  }
  func.func @transform_0(%arg0: i32) -> (i32, i32) {
    %c0_i32 = arith.constant 0 : i32
    %c0_i32_0 = arith.constant 0 : i32
    return %arg0, %c0_i32 : i32, i32
  }
  func.func @transform_1(%arg0: i32) -> (i32, i32) {
    %c0_i32 = arith.constant 0 : i32
    %c0_i32_0 = arith.constant 0 : i32
    %c0_i32_1 = arith.constant 0 : i32
    return %c0_i32, %c0_i32_0 : i32, i32
  }
  func.func @transform_2(%arg0: i32) -> (i32, i32) {
    %c0_i32 = arith.constant 0 : i32
    %c0_i32_0 = arith.constant 0 : i32
    return %arg0, %c0_i32 : i32, i32
  }
  func.func @transform_3(%arg0: i32) -> (i32, i32) {
    %c0_i32 = arith.constant 0 : i32
    %c0_i32_0 = arith.constant 0 : i32
    %c0_i32_1 = arith.constant 0 : i32
    return %c0_i32, %c0_i32_0 : i32, i32
  }
  func.func @transform_4(%arg0: i32) -> (i32, i32) {
    %c0_i32 = arith.constant 0 : i32
    %c0_i32_0 = arith.constant 0 : i32
    return %arg0, %c0_i32 : i32, i32
  }
}

</mosaic_0001>

<bundles_post_ra>
// kernel: tpu_custom_call.1
= control target key start
LH: loop header
LB: loop body
LE: loop exit
PB: predicated region body
PF: predicated region fallthrough
CT: control target
= control target key end

     0   :  { %vm35_vm0 = vcmask 261120   ;;  %s287_s0 = inlined_call_operand.vmem [shape: f32[8,32], index: 0, kind: input, shape index: {}]   ;;  %s288_s1 = inlined_call_operand.vmem [shape: f32[128,32], index: 1, kind: input, shape index: {}]   ;;  %s289_s2 = inlined_call_operand.vmem [shape: f32[8,1], index: 2, kind: input, shape index: {}]   ;;  %s290_s3 = inlined_call_operand.vmem [shape: f32[1,128], index: 3, kind: input, shape index: {}]   ;;  %s291_s4 = inlined_call_operand.hbm [shape: f32[8,128], index: 4, kind: output, shape index: {}]  }
   0x1   :  { %v34_v0 = vld [vmem:[%s288_s1 + $0x78] sm:$0xff]  ;;  %v33_v1 = vld [vmem:[%s288_s1 + $0x70] sm:$0xff] }
   0x2   :  { %136 = vmatpush.xpose.msk.msra.mxu0 %vm35_vm0, %v34_v0 }
   0x3   :  { %9 = vsyncpa [#allocation3], 0  ;;  %v32_v2 = vld [vmem:[%s288_s1 + $0x68] sm:$0xff]  ;;  %v31_v3 = vld [vmem:[%s288_s1 + $0x60] sm:$0xff]  ;;  %v183_v10 = vmov 0   ;;  %s184_s26 = smov [#allocation2]  }
   0x4   :  { %v30_v4 = vld [vmem:[%s288_s1 + $0x58] sm:$0xff]  ;;  %v29_v5 = vld [vmem:[%s288_s1 + $0x50] sm:$0xff]  ;;  %v28_v6 = vld [vmem:[%s288_s1 + $0x48] sm:$0xff]  ;;  %155 = vset.pattern.permute.xlu0 %v183_v10  ;;  %s125_s27 = sshll.u32 %s184_s26, 4  ;;  %s126_s27 = int_to_ptr.vmem [resolvable:$true] %s125_s27 }
   0x5   :  { %v27_v7 = vld [vmem:[%s288_s1 + $0x40] sm:$0xff]  ;;  %v26_v8 = vld [vmem:[%s288_s1 + $0x38] sm:$0xff]  ;;  %v25_v11 = vld [vmem:[%s288_s1 + $0x30] sm:$0xff] }
   0x6   :  { %137 = vmatpush.xpose.msk.msra.mxu0 %vm35_vm0, %v33_v1  ;;  %v107_v9 = vld [vmem:[%s289_s2] sm:$0xff]  ;;  %v24_v12 = vld [vmem:[%s288_s1 + $0x28] sm:$0xff]  ;;  %v22_v14 = vld [vmem:[%s288_s1 + $0x18] sm:$0xff] }
   0x7   :  { %110 = vperm.xlu0 %155, %v107_v9   ;;  %v23_v13 = vld [vmem:[%s288_s1 + $0x20] sm:$0xff]  ;;  %v21_v15 = vld [vmem:[%s288_s1 + $0x10] sm:$0xff]  ;;  %v20_v16 = vld [vmem:[%s288_s1 + $0x8] sm:$0xff] }
   0x8   :  { %v19_v17 = vld [vmem:[%s288_s1] sm:$0xff]  ;;  %s127_s1 = sshll.u32 %s291_s4, 4  ;;  %s128_s1 = int_to_ptr.hbm [resolvable:$true] %s127_s1 }
   0x9   :  { %v18_v18 = vld [vmem:[%s287_s0] sm:$0xff] }
   0xa   :  { %138 = vmatpush.xpose.msk.msra.mxu0 %vm35_vm0, %v32_v2  ;;  %v156_v20 = vld [vmem:[%s290_s3] ss:$0 sm:$0xff] }
   0xe   :  { %139 = vmatpush.xpose.msk.msra.mxu0 %vm35_vm0, %v31_v3 }
  0x12   :  { %140 = vmatpush.xpose.msk.msra.mxu0 %vm35_vm0, %v30_v4 }
  0x16   :  { %141 = vmatpush.xpose.msk.msra.mxu0 %vm35_vm0, %v29_v5 }
  0x1a   :  { %142 = vmatpush.xpose.msk.msra.mxu0 %vm35_vm0, %v28_v6 }
  0x1e   :  { %143 = vmatpush.xpose.msk.msra.mxu0 %vm35_vm0, %v27_v7 }
  0x22   :  { %144 = vmatpush.xpose.msk.msra.mxu0 %vm35_vm0, %v26_v8 }
  0x26   :  { %145 = vmatpush.xpose.msk.msra.mxu0 %vm35_vm0, %v25_v11 }
  0x2a   :  { %146 = vmatpush.xpose.msk.msra.mxu0 %vm35_vm0, %v24_v12 }
  0x2e   :  { %147 = vmatpush.xpose.msk.msra.mxu0 %vm35_vm0, %v23_v13 }
  0x32   :  { %148 = vmatpush.xpose.msk.msra.mxu0 %vm35_vm0, %v22_v14 }
  0x36   :  { %149 = vmatpush.xpose.msk.msra.mxu0 %vm35_vm0, %v21_v15 }
  0x3a   :  { %150 = vmatpush.xpose.msk.msra.mxu0 %vm35_vm0, %v20_v16 }
  0x3e   :  { %151 = vmatpush.xpose.msk.msra.mxu0 %vm35_vm0, %v19_v17 }
  0x41   :  { %152 = vmatmul.msk.f32.vlgmr.msra.gmra.mxu0 %vm35_vm0, %v18_v18 }
  0x79   :  { %v111_v19 = vpop.permute.xlu0 %110 }
  0xbe   :  { %v104_v21 = vpop.f32.mrf.mxu0 }
  0xbf   :  { %v113_v22 = vmul.f32 %v111_v19, %v104_v21 }
  0xc1   :  { %v118_v23 = vmul.f32 %v156_v20, %v113_v22 }
  0xc3   :  { %119 = vst [vmem:[#allocation2] sm:$0xff] %v118_v23 }
  0xc4   :  { %130 = dma.vmem_to_hbm [thread:$0]  %s126_s27, 128, %s128_s1, [#allocation3]  }
  0xc5   :  { %181 = dma.done.wait [#allocation3], 128  }
  0xc6   :  { %182 = vsyncadd [#allocation3], 4294967168 }
  0xc7   :  { %135 = vsyncpa [#allocation3], 1 }

</bundles_post_ra>
